<compile_context>
chip_gen: v5e
topology: v5e:2x2
jax: 0.10.0
libtpu: 0.0.40
codegen_flags: <defaults>
</compile_context>

<pallas_src>
import jax
import jax.numpy as jnp
import numpy as np
from jax.experimental import pallas as pl
from jax.experimental.pallas import tpu as pltpu

# AngularEncoding(num_funcs=3) frequency bands: [1, 2, 3, 1, 1/2, 1/3]
FREQS = (1.0, 2.0, 3.0, 1.0, 1.0 / 2.0, 1.0 / 3.0)
NUM_DIHED = 6                          # phi, psi, 4 chi
ANG_DIM = 1 + 2 * len(FREQS)           # 13 per dihedral
DIHED_FEAT = NUM_DIHED * ANG_DIM       # 78 = AngularEncoding.get_out_dim(6)
LANE = 128

# Packed per-residue input lane layout: one (R, PACK_W) f32 slab.
PACK_W = 16
LANE_DIHED = 0        # lanes 0..5   : phi, psi, chi1..chi4
LANE_DMASK = 6        # lanes 6..11  : their masks
LANE_RESMASK = 12     # lane 12      : residue mask
LANE_AA = 13          # lane 13      : aatype index (as float; exact for <2^24)

# Fused layer-1 LHS layout (K1 = 128 lanes):
K1 = 128
CODE_OFF = 32                                       # aatype one-hot: [0, 32)
RAW_END = CODE_OFF + NUM_DIHED                      # raw-angle block ends at 38
SIN_END = CODE_OFF + (1 + len(FREQS)) * NUM_DIHED   # sin blocks end at 74


def _round_up(x, m):
    return (x + m - 1) // m * m


def _cdiv(a, b):
    return (a + b - 1) // b


# ----------------------------------------------------------------------------
# Kernel
# ----------------------------------------------------------------------------
def _encoder_kernel(packed_ref, sel_freq_ref, sel_mask_ref, w1f_ref,
                    w2_ref, w3_ref, w4_ref, bias_ref, out_ref):
    cdt = w1f_ref.dtype                      # MXU weight dtype (f32 or bf16)
    tr = packed_ref.shape[0]

    packed = packed_ref[...]                                     # (TR, 16) f32

    # --- lane-dense angular encoding ----------------------------------------
    # One K=16 matmul scatters the dihedrals (packed rows 0-5) to their 78
    # code lanes with the frequency multiplier baked in; another scatters the
    # dihedral masks (rows 6-11).  Then a single sin and a single cos run over
    # the full 128-lane slab, and constant lane-selects pick raw/sin/cos.
    d_wide = jnp.dot(packed, sel_freq_ref[...],
                     preferred_element_type=jnp.float32)         # (TR, 128)
    dm_wide = jnp.dot(packed, sel_mask_ref[...],
                      preferred_element_type=jnp.float32)        # (TR, 128)
    s_wide = jnp.sin(d_wide)
    c_wide = jnp.cos(d_wide)

    col = jax.lax.broadcasted_iota(jnp.int32, (tr, K1), 1)
    code = jnp.where(col < RAW_END, d_wide,
                     jnp.where(col < SIN_END, s_wide, c_wide)) * dm_wide

    # aatype one-hot occupies lanes [0, CODE_OFF); code occupies
    # [CODE_OFF, CODE_OFF+78).  Disjoint, so add instead of concat.
    aa = packed[:, LANE_AA:LANE_AA + 1]                          # (TR, 1) f32
    onehot = ((aa == col.astype(jnp.float32))
              & (col < CODE_OFF)).astype(jnp.float32)
    lhs = onehot + code                                          # (TR, 128)

    # --- 4-layer MLP (single fused K=128 layer-1 pass, f32 accumulation) ----
    # Embedding table and layer-1 bias are folded into w1f offline.
    h = jnp.maximum(jnp.dot(lhs.astype(cdt), w1f_ref[...],
                            preferred_element_type=jnp.float32), 0.0)
    h = jnp.maximum(jnp.dot(h.astype(cdt), w2_ref[...],
                            preferred_element_type=jnp.float32)
                    + bias_ref[0:1, :], 0.0)
    h = jnp.maximum(jnp.dot(h.astype(cdt), w3_ref[...],
                            preferred_element_type=jnp.float32)
                    + bias_ref[1:2, :], 0.0)
    h = jnp.dot(h.astype(cdt), w4_ref[...],
                preferred_element_type=jnp.float32) + bias_ref[2:3, :]

    # --- residue mask; lane-dense (128-wide) store ---------------------------
    resmask = packed[:, LANE_RESMASK:LANE_RESMASK + 1]           # (TR, 1)
    out_ref[...] = (h * resmask).astype(out_ref.dtype)


# ----------------------------------------------------------------------------
# Parameter prep (offline)
# ----------------------------------------------------------------------------
def make_params(key, feat_dim, max_aa_types=22):
    """Raw parameters matching the PyTorch module layout."""
    infeat_dim = feat_dim + DIHED_FEAT
    ks = jax.random.split(key, 9)
    s = 0.05
    return {
        "embed": jax.random.normal(ks[0], (max_aa_types, feat_dim), jnp.float32) * s,
        "w1": jax.random.normal(ks[1], (infeat_dim, feat_dim * 2), jnp.float32) * s,
        "b1": jax.random.normal(ks[2], (1, feat_dim * 2), jnp.float32) * s,
        "w2": jax.random.normal(ks[3], (feat_dim * 2, feat_dim), jnp.float32) * s,
        "b2": jax.random.normal(ks[4], (1, feat_dim), jnp.float32) * s,
        "w3": jax.random.normal(ks[5], (feat_dim, feat_dim), jnp.float32) * s,
        "b3": jax.random.normal(ks[6], (1, feat_dim), jnp.float32) * s,
        "w4": jax.random.normal(ks[7], (feat_dim, feat_dim), jnp.float32) * s,
        "b4": jax.random.normal(ks[8], (1, feat_dim), jnp.float32) * s,
    }


def _pad2d(x, rows, cols):
    r, c = x.shape
    return jnp.pad(x, ((0, rows - r), (0, cols - c)))


def prepare_kernel_params(params, feat_dim, max_aa_types=22,
                          compute_dtype=jnp.float32):
    """Fold the embedding table and layer-1 bias into one fused (128, H1p)
    layer-1 weight (aatype rows at [0, max_aa), permuted dihedral-code rows at
    [CODE_OFF, CODE_OFF+78)), build the constant lane-scatter selectors, pack
    b2/b3/b4 into one buffer, zero-pad all hidden dims to 128 lanes, and
    pre-cast the MXU weights to `compute_dtype`."""
    assert max_aa_types <= CODE_OFF and CODE_OFF + DIHED_FEAT <= K1
    F, H1 = feat_dim, 2 * feat_dim
    Fp, H1p = _round_up(F, LANE), _round_up(H1, LANE)

    w1 = params["w1"]
    w1_aa, w1_code = w1[:F], w1[F:]                        # (F, 2F), (78, 2F)

    # fold the aatype embedding AND the layer-1 bias into the aatype rows
    # (the one-hot selects exactly one row, so the bias is added exactly once)
    e_w1 = jnp.dot(params["embed"], w1_aa,
                   precision=jax.lax.Precision.HIGHEST) + params["b1"]

    # permute code rows: reference dihedral-major order j*13+k -> k*6+j
    w1c = w1_code.reshape(NUM_DIHED, ANG_DIM, H1)
    w1c = jnp.transpose(w1c, (1, 0, 2)).reshape(DIHED_FEAT, H1)

    w1f = jnp.zeros((K1, H1p), jnp.float32)
    w1f = w1f.at[:max_aa_types, :H1].set(e_w1)
    w1f = w1f.at[CODE_OFF:CODE_OFF + DIHED_FEAT, :H1].set(w1c)

    # constant selector matrices: packed-input rows -> 128 code lanes
    freq_mult = np.array((1.0,) + FREQS + FREQS, np.float32)   # 13 blocks
    sel_freq = np.zeros((PACK_W, K1), np.float32)
    sel_mask = np.zeros((PACK_W, K1), np.float32)
    for k in range(len(freq_mult)):
        for j in range(NUM_DIHED):
            c = CODE_OFF + k * NUM_DIHED + j
            sel_freq[LANE_DIHED + j, c] = freq_mult[k]
            sel_mask[LANE_DMASK + j, c] = 1.0

    # b2 / b3 / b4 packed into one (8, Fp) replicated buffer (rows 0/1/2)
    bias = jnp.zeros((8, Fp), jnp.float32)
    bias = bias.at[0, :F].set(params["b2"][0])
    bias = bias.at[1, :F].set(params["b3"][0])
    bias = bias.at[2, :F].set(params["b4"][0])

    return {
        "sel_freq": jnp.asarray(sel_freq),
        "sel_mask": jnp.asarray(sel_mask),
        "w1f": w1f.astype(compute_dtype),
        "w2": _pad2d(params["w2"], H1p, Fp).astype(compute_dtype),
        "w3": _pad2d(params["w3"], Fp, Fp).astype(compute_dtype),
        "w4": _pad2d(params["w4"], Fp, Fp).astype(compute_dtype),
        "bias": bias,
    }


# ----------------------------------------------------------------------------
# Wrapper
# ----------------------------------------------------------------------------
def per_residue_encoder_v1(aa, phi, phi_mask, psi, psi_mask, chi, chi_mask,
                           mask_residue, kparams, feat_dim, tile_rows=1024,
                           out_dtype=jnp.float32):
    # TODO(synk): use_sasa=True branch (extra SASA feature column) not implemented.
    # NOTE: aa values >= max_aa_types silently map to a zero embedding (the
    # PyTorch nn.Embedding would raise instead).
    N, L = aa.shape
    R = N * L
    Fp = kparams["w4"].shape[1]                 # padded (lane-dense) out width

    # --- pack all per-residue scalars into one (R, 16) f32 slab -------------
    dihedral = jnp.concatenate(
        [phi[..., None], psi[..., None], chi], axis=-1).reshape(R, NUM_DIHED)
    dmask = jnp.concatenate(
        [phi_mask[..., None], psi_mask[..., None], chi_mask],
        axis=-1).reshape(R, NUM_DIHED)
    packed = jnp.concatenate([
        dihedral.astype(jnp.float32),                       # lanes 0..5
        dmask.astype(jnp.float32),                          # lanes 6..11
        mask_residue.reshape(R, 1).astype(jnp.float32),     # lane 12
        aa.reshape(R, 1).astype(jnp.float32),               # lane 13
        jnp.zeros((R, PACK_W - (2 * NUM_DIHED + 2)), jnp.float32),
    ], axis=-1)

    # --- row tile: large default; cap at ceil(R/2) so the "parallel" axis
    #     always has >= 2 tiles for v7x's two TensorCores (no-op on 1-TC) ----
    TR = max(8, min(_round_up(int(tile_rows), 8), _round_up(_cdiv(R, 2), 8)))
    n_tiles = _cdiv(R, TR)
    R_pad = n_tiles * TR
    if R_pad != R:
        packed = jnp.pad(packed, ((0, R_pad - R), (0, 0)))

    weight_names = ("sel_freq", "sel_mask", "w1f", "w2", "w3", "w4", "bias")
    weights = [kparams[k] for k in weight_names]

    out = pl.pallas_call(
        _encoder_kernel,
        out_shape=jax.ShapeDtypeStruct((R_pad, Fp), out_dtype),
        grid=(n_tiles,),
        in_specs=[pl.BlockSpec((TR, PACK_W), lambda i: (i, 0))]
                 + [pl.BlockSpec(w.shape, lambda i: (0, 0)) for w in weights],
        out_specs=pl.BlockSpec((TR, Fp), lambda i: (i, 0)),
        compiler_params=pltpu.CompilerParams(
            dimension_semantics=("parallel",)),
    )(packed, *weights)

    return out[:R, :feat_dim].reshape(N, L, feat_dim)


# ----------------------------------------------------------------------------
# Pure-JAX reference (replicates the PyTorch forward pass)
# ----------------------------------------------------------------------------
def reference_jax(aa, phi, phi_mask, psi, psi_mask, chi, chi_mask,
                  mask_residue, params):
    N, L = aa.shape
    aa_feat = params["embed"][aa]                                      # (N,L,F)
    dihedral = jnp.concatenate([phi[..., None], psi[..., None], chi], axis=-1)
    dihedral_mask = jnp.concatenate(
        [phi_mask[..., None], psi_mask[..., None], chi_mask], axis=-1)
    x = dihedral[..., None, None]                                      # (N,L,6,1,1)
    freq = jnp.asarray(FREQS, jnp.float32)
    code = jnp.concatenate([x, jnp.sin(x * freq), jnp.cos(x * freq)], axis=-1)
    code = code.reshape(N, L, NUM_DIHED, ANG_DIM) * dihedral_mask[..., None]
    dihed_feat = code.reshape(N, L, DIHED_FEAT)
    h = jnp.concatenate([aa_feat, dihed_feat], axis=-1)
    h = jnp.maximum(h @ params["w1"] + params["b1"][0], 0.0)
    h = jnp.maximum(h @ params["w2"] + params["b2"][0], 0.0)
    h = jnp.maximum(h @ params["w3"] + params["b3"][0], 0.0)
    h = h @ params["w4"] + params["b4"][0]
    return h * mask_residue[..., None]


def make_inputs(key, N, L, max_aa):
    ka, k1, k2, k3, k4, k5, k6, k7 = jax.random.split(key, 8)
    aa = jax.random.randint(ka, (N, L), 0, max_aa, jnp.int32)
    phi = jax.random.uniform(k1, (N, L), jnp.float32, -np.pi, np.pi)
    psi = jax.random.uniform(k2, (N, L), jnp.float32, -np.pi, np.pi)
    chi = jax.random.uniform(k3, (N, L, 4), jnp.float32, -np.pi, np.pi)
    phi_mask = (jax.random.uniform(k4, (N, L)) > 0.2).astype(jnp.float32)
    psi_mask = (jax.random.uniform(k5, (N, L)) > 0.2).astype(jnp.float32)
    chi_mask = (jax.random.uniform(k6, (N, L, 4)) > 0.3).astype(jnp.float32)
    mask_residue = (jax.random.uniform(k7, (N, L)) > 0.1).astype(jnp.float32)
    return aa, phi, phi_mask, psi, psi_mask, chi, chi_mask, mask_residue


if __name__ == "__main__":
    feat_dim, max_aa = 32, 22
    key = jax.random.PRNGKey(0)
    kp, kin_a, kin_b = jax.random.split(key, 3)

    params = make_params(kp, feat_dim, max_aa)

    # 1) f32 weights, f32 output: tight tolerance vs reference.
    #    R=16 -> 2 tiles of 8 (core-aware cap), exercising the parallel grid.
    inputs_a = make_inputs(kin_a, 2, 8, max_aa)
    ref_a = reference_jax(*inputs_a, params)
    kp_f32 = prepare_kernel_params(params, feat_dim, max_aa,
                                   compute_dtype=jnp.float32)
    out_a = per_residue_encoder_v1(*inputs_a, kp_f32, feat_dim)
    out_a = jax.block_until_ready(out_a)
    np.testing.assert_allclose(np.asarray(out_a), np.asarray(ref_a),
                               rtol=1e-4, atol=1e-4)

    # 2) bf16 MXU weights (f32 accumulation) + bf16 output store, small row
    #    tile to exercise the multi-tile grid and the row-padding path
    #    (R=22 -> 3 tiles of 8).
    inputs_b = make_inputs(kin_b, 2, 11, max_aa)
    ref_b = reference_jax(*inputs_b, params)
    kp_bf16 = prepare_kernel_params(params, feat_dim, max_aa,
                                    compute_dtype=jnp.bfloat16)
    out_b = per_residue_encoder_v1(*inputs_b, kp_bf16, feat_dim,
                                   tile_rows=8, out_dtype=jnp.bfloat16)
    out_b = jax.block_until_ready(out_b)
    np.testing.assert_allclose(np.asarray(out_b.astype(jnp.float32)),
                               np.asarray(ref_b), rtol=2e-2, atol=2e-2)

    print("KERNEL_OK")
</pallas_src>

<mosaic_0001>
module attributes {stable_mosaic.version = 11 : i64} {
  func.func @_encoder_kernel(%arg0: i32, %arg1: memref<8x16xf32, #tpu.memory_space<vmem>>, %arg2: memref<16x128xf32, #tpu.memory_space<vmem>>, %arg3: memref<16x128xf32, #tpu.memory_space<vmem>>, %arg4: memref<128x128xf32, #tpu.memory_space<vmem>>, %arg5: memref<128x128xf32, #tpu.memory_space<vmem>>, %arg6: memref<128x128xf32, #tpu.memory_space<vmem>>, %arg7: memref<128x128xf32, #tpu.memory_space<vmem>>, %arg8: memref<8x128xf32, #tpu.memory_space<vmem>>, %arg9: memref<8x128xf32, #tpu.memory_space<vmem>>) attributes {dimension_semantics = [#tpu.dimension_semantics<parallel>], iteration_bounds = array<i64: 2>, scalar_prefetch = 0 : i64, scratch_operands = 0 : i64, tpu.core_type = #tpu.core_type<tc>, window_params = [{transform_indices = @transform_0, window_bounds = array<i64: 8, 16>}, {pipeline_mode = #tpu.pipeline_mode<synchronous>, transform_indices = @transform_1, window_bounds = array<i64: 16, 128>}, {pipeline_mode = #tpu.pipeline_mode<synchronous>, transform_indices = @transform_2, window_bounds = array<i64: 16, 128>}, {pipeline_mode = #tpu.pipeline_mode<synchronous>, transform_indices = @transform_3, window_bounds = array<i64: 128, 128>}, {pipeline_mode = #tpu.pipeline_mode<synchronous>, transform_indices = @transform_4, window_bounds = array<i64: 128, 128>}, {pipeline_mode = #tpu.pipeline_mode<synchronous>, transform_indices = @transform_5, window_bounds = array<i64: 128, 128>}, {pipeline_mode = #tpu.pipeline_mode<synchronous>, transform_indices = @transform_6, window_bounds = array<i64: 128, 128>}, {pipeline_mode = #tpu.pipeline_mode<synchronous>, transform_indices = @transform_7, window_bounds = array<i64: 8, 128>}, {transform_indices = @transform_8, window_bounds = array<i64: 8, 128>}]} {
    %c0 = arith.constant 0 : index
    %c0_0 = arith.constant 0 : index
    %0 = vector.load %arg1[%c0, %c0_0] : memref<8x16xf32, #tpu.memory_space<vmem>>, vector<8x16xf32>
    %c0_1 = arith.constant 0 : index
    %c0_2 = arith.constant 0 : index
    %1 = vector.load %arg2[%c0_1, %c0_2] : memref<16x128xf32, #tpu.memory_space<vmem>>, vector<16x128xf32>
    %cst = arith.constant dense<0.000000e+00> : vector<8x128xf32>
    %2 = tpu.matmul %0, %1, %cst {dimension_numbers = #tpu.dot_dimension_numbers<[1], [0], [0], [1], [0, 0, 1, 1], [], []>} : vector<8x16xf32>, vector<16x128xf32>, vector<8x128xf32> -> vector<8x128xf32>
    %c0_3 = arith.constant 0 : index
    %c0_4 = arith.constant 0 : index
    %3 = vector.load %arg3[%c0_3, %c0_4] : memref<16x128xf32, #tpu.memory_space<vmem>>, vector<16x128xf32>
    %cst_5 = arith.constant dense<0.000000e+00> : vector<8x128xf32>
    %4 = tpu.matmul %0, %3, %cst_5 {dimension_numbers = #tpu.dot_dimension_numbers<[1], [0], [0], [1], [0, 0, 1, 1], [], []>} : vector<8x16xf32>, vector<16x128xf32>, vector<8x128xf32> -> vector<8x128xf32>
    %5 = math.sin %2 : vector<8x128xf32>
    %6 = math.cos %2 : vector<8x128xf32>
    %7 = tpu.iota {dimensions = array<i32: 1>} : vector<8x128xi32>
    %c38_i32 = arith.constant 38 : i32
    %8 = vector.broadcast %c38_i32 : i32 to vector<8x128xi32>
    %9 = arith.cmpi slt, %7, %8 : vector<8x128xi32>
    %c74_i32 = arith.constant 74 : i32
    %10 = vector.broadcast %c74_i32 : i32 to vector<8x128xi32>
    %11 = arith.cmpi slt, %7, %10 : vector<8x128xi32>
    %12 = arith.select %11, %5, %6 : vector<8x128xi1>, vector<8x128xf32>
    %13 = arith.select %9, %2, %12 : vector<8x128xi1>, vector<8x128xf32>
    %14 = arith.mulf %13, %4 : vector<8x128xf32>
    %15 = vector.extract_strided_slice %0 {offsets = [0, 13], sizes = [8, 1], strides = [1, 1]} : vector<8x16xf32> to vector<8x1xf32>
    %16 = arith.sitofp %7 : vector<8x128xi32> to vector<8x128xf32>
    %17 = vector.broadcast %15 : vector<8x1xf32> to vector<8x128xf32>
    %18 = arith.cmpf oeq, %17, %16 : vector<8x128xf32>
    %c32_i32 = arith.constant 32 : i32
    %19 = vector.broadcast %c32_i32 : i32 to vector<8x128xi32>
    %20 = arith.cmpi slt, %7, %19 : vector<8x128xi32>
    %21 = arith.andi %18, %20 : vector<8x128xi1>
    %22 = arith.extui %21 : vector<8x128xi1> to vector<8x128xi32>
    %23 = arith.sitofp %22 : vector<8x128xi32> to vector<8x128xf32>
    %24 = arith.addf %23, %14 : vector<8x128xf32>
    %c0_6 = arith.constant 0 : index
    %c0_7 = arith.constant 0 : index
    %25 = vector.load %arg4[%c0_6, %c0_7] : memref<128x128xf32, #tpu.memory_space<vmem>>, vector<128x128xf32>
    %cst_8 = arith.constant dense<0.000000e+00> : vector<8x128xf32>
    %26 = tpu.matmul %24, %25, %cst_8 {dimension_numbers = #tpu.dot_dimension_numbers<[1], [0], [0], [1], [0, 0, 1, 1], [], []>} : vector<8x128xf32>, vector<128x128xf32>, vector<8x128xf32> -> vector<8x128xf32>
    %cst_9 = arith.constant 0.000000e+00 : f32
    %27 = vector.broadcast %cst_9 : f32 to vector<8x128xf32>
    %28 = arith.maximumf %26, %27 : vector<8x128xf32>
    %c0_10 = arith.constant 0 : index
    %c0_11 = arith.constant 0 : index
    %29 = vector.load %arg5[%c0_10, %c0_11] : memref<128x128xf32, #tpu.memory_space<vmem>>, vector<128x128xf32>
    %cst_12 = arith.constant dense<0.000000e+00> : vector<8x128xf32>
    %30 = tpu.matmul %28, %29, %cst_12 {dimension_numbers = #tpu.dot_dimension_numbers<[1], [0], [0], [1], [0, 0, 1, 1], [], []>} : vector<8x128xf32>, vector<128x128xf32>, vector<8x128xf32> -> vector<8x128xf32>
    %c0_13 = arith.constant 0 : index
    %c0_14 = arith.constant 0 : index
    %31 = vector.load %arg8[%c0_13, %c0_14] : memref<8x128xf32, #tpu.memory_space<vmem>>, vector<1x128xf32>
    %32 = vector.broadcast %31 : vector<1x128xf32> to vector<8x128xf32>
    %33 = arith.addf %30, %32 : vector<8x128xf32>
    %cst_15 = arith.constant 0.000000e+00 : f32
    %34 = vector.broadcast %cst_15 : f32 to vector<8x128xf32>
    %35 = arith.maximumf %33, %34 : vector<8x128xf32>
    %c0_16 = arith.constant 0 : index
    %c0_17 = arith.constant 0 : index
    %36 = vector.load %arg6[%c0_16, %c0_17] : memref<128x128xf32, #tpu.memory_space<vmem>>, vector<128x128xf32>
    %cst_18 = arith.constant dense<0.000000e+00> : vector<8x128xf32>
    %37 = tpu.matmul %35, %36, %cst_18 {dimension_numbers = #tpu.dot_dimension_numbers<[1], [0], [0], [1], [0, 0, 1, 1], [], []>} : vector<8x128xf32>, vector<128x128xf32>, vector<8x128xf32> -> vector<8x128xf32>
    %c1 = arith.constant 1 : index
    %c0_19 = arith.constant 0 : index
    %38 = vector.load %arg8[%c1, %c0_19] : memref<8x128xf32, #tpu.memory_space<vmem>>, vector<1x128xf32>
    %39 = vector.broadcast %38 : vector<1x128xf32> to vector<8x128xf32>
    %40 = arith.addf %37, %39 : vector<8x128xf32>
    %cst_20 = arith.constant 0.000000e+00 : f32
    %41 = vector.broadcast %cst_20 : f32 to vector<8x128xf32>
    %42 = arith.maximumf %40, %41 : vector<8x128xf32>
    %c0_21 = arith.constant 0 : index
    %c0_22 = arith.constant 0 : index
    %43 = vector.load %arg7[%c0_21, %c0_22] : memref<128x128xf32, #tpu.memory_space<vmem>>, vector<128x128xf32>
    %cst_23 = arith.constant dense<0.000000e+00> : vector<8x128xf32>
    %44 = tpu.matmul %42, %43, %cst_23 {dimension_numbers = #tpu.dot_dimension_numbers<[1], [0], [0], [1], [0, 0, 1, 1], [], []>} : vector<8x128xf32>, vector<128x128xf32>, vector<8x128xf32> -> vector<8x128xf32>
    %c2 = arith.constant 2 : index
    %c0_24 = arith.constant 0 : index
    %45 = vector.load %arg8[%c2, %c0_24] : memref<8x128xf32, #tpu.memory_space<vmem>>, vector<1x128xf32>
    %46 = vector.broadcast %45 : vector<1x128xf32> to vector<8x128xf32>
    %47 = arith.addf %44, %46 : vector<8x128xf32>
    %48 = vector.extract_strided_slice %0 {offsets = [0, 12], sizes = [8, 1], strides = [1, 1]} : vector<8x16xf32> to vector<8x1xf32>
    %49 = vector.broadcast %48 : vector<8x1xf32> to vector<8x128xf32>
    %50 = arith.mulf %47, %49 : vector<8x128xf32>
    %c0_25 = arith.constant 0 : index
    %c0_26 = arith.constant 0 : index
    %51 = vector.load %arg9[%c0_25, %c0_26] : memref<8x128xf32, #tpu.memory_space<vmem>>, vector<8x128xf32>
    tpu.vector_store %arg9[%c0_25, %c0_26], %50 {strides = array<i32>} : memref<8x128xf32, #tpu.memory_space<vmem>>, vector<8x128xf32>,
    return
  }
  func.func @transform_0(%arg0: i32) -> (i32, i32) {
    %c0_i32 = arith.constant 0 : i32
    %c0_i32_0 = arith.constant 0 : i32
    return %arg0, %c0_i32 : i32, i32
  }
  func.func @transform_1(%arg0: i32) -> (i32, i32) {
    %c0_i32 = arith.constant 0 : i32
    %c0_i32_0 = arith.constant 0 : i32
    %c0_i32_1 = arith.constant 0 : i32
    return %c0_i32, %c0_i32_0 : i32, i32
  }
  func.func @transform_2(%arg0: i32) -> (i32, i32) {
    %c0_i32 = arith.constant 0 : i32
    %c0_i32_0 = arith.constant 0 : i32
    %c0_i32_1 = arith.constant 0 : i32
    return %c0_i32, %c0_i32_0 : i32, i32
  }
  func.func @transform_3(%arg0: i32) -> (i32, i32) {
    %c0_i32 = arith.constant 0 : i32
    %c0_i32_0 = arith.constant 0 : i32
    %c0_i32_1 = arith.constant 0 : i32
    return %c0_i32, %c0_i32_0 : i32, i32
  }
  func.func @transform_4(%arg0: i32) -> (i32, i32) {
    %c0_i32 = arith.constant 0 : i32
    %c0_i32_0 = arith.constant 0 : i32
    %c0_i32_1 = arith.constant 0 : i32
    return %c0_i32, %c0_i32_0 : i32, i32
  }
  func.func @transform_5(%arg0: i32) -> (i32, i32) {
    %c0_i32 = arith.constant 0 : i32
    %c0_i32_0 = arith.constant 0 : i32
    %c0_i32_1 = arith.constant 0 : i32
    return %c0_i32, %c0_i32_0 : i32, i32
  }
  func.func @transform_6(%arg0: i32) -> (i32, i32) {
    %c0_i32 = arith.constant 0 : i32
    %c0_i32_0 = arith.constant 0 : i32
    %c0_i32_1 = arith.constant 0 : i32
    return %c0_i32, %c0_i32_0 : i32, i32
  }
  func.func @transform_7(%arg0: i32) -> (i32, i32) {
    %c0_i32 = arith.constant 0 : i32
    %c0_i32_0 = arith.constant 0 : i32
    %c0_i32_1 = arith.constant 0 : i32
    return %c0_i32, %c0_i32_0 : i32, i32
  }
  func.func @transform_8(%arg0: i32) -> (i32, i32) {
    %c0_i32 = arith.constant 0 : i32
    %c0_i32_0 = arith.constant 0 : i32
    return %arg0, %c0_i32 : i32, i32
  }
}

</mosaic_0001>

<bundles_post_ra>
// kernel: tpu_custom_call.1
= control target key start
LH: loop header
LB: loop body
LE: loop exit
PB: predicated region body
PF: predicated region fallthrough
CT: control target
= control target key end

     0   :  { %s1971_s0 = inlined_call_operand.hbm [shape: f32[16,16], index: 0, kind: input, shape index: {}]   ;;  %s1972_s1 = inlined_call_operand.hbm [shape: f32[16,128], index: 1, kind: input, shape index: {}]   ;;  %s1973_s2 = inlined_call_operand.hbm [shape: f32[16,128], index: 2, kind: input, shape index: {}]   ;;  %s1974_s3 = inlined_call_operand.hbm [shape: f32[128,128], index: 3, kind: input, shape index: {}]   ;;  %s1975_s4 = inlined_call_operand.hbm [shape: f32[128,128], index: 4, kind: input, shape index: {}]   ;;  %s1976_s5 = inlined_call_operand.hbm [shape: f32[128,128], index: 5, kind: input, shape index: {}]   ;;  %s1977_s6 = inlined_call_operand.hbm [shape: f32[128,128], index: 6, kind: input, shape index: {}]   ;;  %s1978_s7 = inlined_call_operand.hbm [shape: f32[8,128], index: 7, kind: input, shape index: {}]   ;;  %s1979_s8 = inlined_call_operand.hbm [shape: f32[16,128], index: 8, kind: output, shape index: {}]  }
   0x1   :  { %1980 = sst [smem:[#allocation23_spill]] %s1972_s1 }
   0x2   :  { %1981 = sst [smem:[#allocation24_spill]] %s1973_s2 }
   0x3   :  { %13 = vsyncpa [#allocation3], 0 }
   0x4   :  { %15 = vsyncpa [#allocation3 + $0x1], 0 }
   0x5   :  { %16 = vsyncpa [#allocation6], 0 }
   0x6   :  { %17 = vsyncpa [#allocation9], 0 }
   0x7   :  { %18 = vsyncpa [#allocation12], 0 }
   0x8   :  { %19 = vsyncpa [#allocation15], 0 }
   0x9   :  { %20 = vsyncpa [#allocation4], 0 }
   0xa   :  { %22 = vsyncpa [#allocation4 + $0x1], 0  ;;  %s1682_s27 = smov 0   ;;  %s1684_s28 = smov 0  }
   0xb   :  { %s1686_s29 = smov 0   ;;  %s1688_s30 = smov 0  }
   0xc LB: > { %s1982_s1 = sld [smem:[#allocation23_spill]]  ;;  %s1706_s12 = sadd.s32 4294967295, %s1616_s30   ;;  %s1616_s30 = sphi %s1688_s30, %s1996_s30   ;;  %s1612_s29 = sphi %s1686_s29, %s1995_s29   ;;  %s1608_s28 = sphi %s1684_s28, %s1994_s28   ;;  %s1604_s27 = sphi %s1682_s27, %s1993_s27  }
   0xd   : > { %p1126_p0 = scmp.ge.s32.totalorder %s1616_s30, 1  ;;  %p49_p1 = scmp.eq.s32.totalorder %s1706_s12, 0 }
   0xe   : > { %p232_p2 = scmp.lt.s32.totalorder %s1616_s30, 3  ;;  %s1618_s14 = smov [#allocation5]  }
   0xf   : > { %s245_s15 = sshll.u32 %s1618_s14, 4  ;;  %s271_s18 = sshll.u32 %s1974_s3, 4  ;;  %s246_s15 = int_to_ptr.vmem [resolvable:$true] %s245_s15  ;;  %s272_s18 = int_to_ptr.hbm [resolvable:$true] %s271_s18 }
  0x10   : > { %p1711_p3 = pnand %p1126_p0, %p232_p2  ;;  %s299_s22 = sshll.u32 %s1976_s5, 4  ;;  %s300_s22 = int_to_ptr.hbm [resolvable:$true] %s299_s22 }
  0x11   : > { %s1619_s23 = smov [#allocation8]   ;;  %s1620_s25 = smov 128  }
  0x12   : > { %s243_s11 = sshll.u32 %s1982_s1, 4  ;;  %p1192_p4 = pneg %p1711_p3  ;;  %s244_s11 = int_to_ptr.hbm [resolvable:$true] %s243_s11 }
  0x13   : > { %s273_s24 = sshll.u32 %s1619_s23, 4  ;;  %s1621_s26 = smov 8   ;;  %s274_s24 = int_to_ptr.vmem [resolvable:$true] %s273_s24 }
  0x14   : > { %p1723_p6 = pnand %p1192_p4, %p49_p1  ;;  %s1985_s2 = sld [smem:[#allocation24_spill]] }
  0x15   : > { %s1622_s16 = smov [#allocation11]   ;;  %s313_s9 = sshll.u32 %s1977_s6, 4  ;;  %s314_s9 = int_to_ptr.hbm [resolvable:$true] %s313_s9 }
  0x16   : > { %1195 = dma.hbm_to_vmem [thread:$0]  (!%p1723_p6), %s244_s11, 256, %s246_s15, [#allocation6], %s1620_s25, %s1620_s25, %s1621_s26  }
  0x17   : > { %1201 = dma.hbm_to_vmem [thread:$0]  (!%p1723_p6), %s272_s18, 2048, %s274_s24, [#allocation9], %s1620_s25, %s1620_s25, %s1621_s26  }
  0x18   : > { %s301_s17 = sshll.u32 %s1622_s16, 4  ;;  %s1623_s11 = smov [#allocation7]   ;;  %s302_s17 = int_to_ptr.vmem [resolvable:$true] %s301_s17 }
  0x19   : > { %1207 = dma.hbm_to_vmem [thread:$0]  (!%p1723_p6), %s300_s22, 2048, %s302_s17, [#allocation12], %s1620_s25, %s1620_s25, %s1621_s26  }
  0x1a   : > { %s257_s14 = sshll.u32 %s1985_s2, 4  ;;  %s259_s15 = sshll.u32 %s1623_s11, 4  ;;  %s258_s14 = int_to_ptr.hbm [resolvable:$true] %s257_s14  ;;  %s260_s15 = int_to_ptr.vmem [resolvable:$true] %s259_s15 }
  0x1b   : > { %s285_s18 = sshll.u32 %s1975_s4, 4  ;;  %s1624_s22 = smov [#allocation10]   ;;  %s286_s18 = int_to_ptr.hbm [resolvable:$true] %s285_s18 }
  0x1c   : > { %1198 = dma.hbm_to_vmem [thread:$0]  (!%p1723_p6), %s258_s14, 256, %s260_s15, [#allocation6], %s1620_s25, %s1620_s25, %s1621_s26  }
  0x1d   : > { %s287_s10 = sshll.u32 %s1624_s22, 4  ;;  %s1625_s14 = smov [#allocation13]   ;;  %s288_s10 = int_to_ptr.vmem [resolvable:$true] %s287_s10 }
  0x1e   : > { %1204 = dma.hbm_to_vmem [thread:$0]  (!%p1723_p6), %s286_s18, 2048, %s288_s10, [#allocation9], %s1620_s25, %s1620_s25, %s1621_s26  }
  0x1f   : > { %s315_s16 = sshll.u32 %s1625_s14, 4  ;;  %s328_s15 = sshll.u32 %s1978_s7, 4  ;;  %s316_s16 = int_to_ptr.vmem [resolvable:$true] %s315_s16  ;;  %s329_s15 = int_to_ptr.hbm [resolvable:$true] %s328_s15 }
  0x20   : > { %1210 = dma.hbm_to_vmem [thread:$0]  (!%p1723_p6), %s314_s9, 2048, %s316_s16, [#allocation12], %s1620_s25, %s1620_s25, %s1621_s26  }
  0x21   : > { %s1626_s20 = smov [#allocation14]   ;;  %s1125_s18 = sadd.s32 4294967294, %s1616_s30  }
  0x22   : > { %s330_s21 = sshll.u32 %s1626_s20, 4  ;;  %s1776_s23 = sadd.s32 1, %s1616_s30   ;;  %s331_s21 = int_to_ptr.vmem [resolvable:$true] %s330_s21 }
  0x23   : > { %1213 = dma.hbm_to_vmem [thread:$0]  (!%p1723_p6), %s329_s15, 128, %s331_s21, [#allocation15]  }
  0x24   : > { %s35_s24 = sadd.s32 1, %s1612_s29  ;;  %s32_s22 = ssub.s32 %s1616_s30, %s1776_s23 }
  0x25   : > { %p42_p7 = scmp.ne.s32.totalorder %s1612_s29, %s1608_s28  ;;  %p33_p8 = scmp.eq.s32.totalorder %s32_s22, 0 }
  0x26   : > { %p43_p9 = scmp.eq.s32.totalorder %s1616_s30, 0  ;;  %p48_p10 = scmp.ne.s32.totalorder %s1608_s28, %s1604_s27 }
  0x27   : > { %p219_p11 = scmp.eq.s32.totalorder %s1706_s12, 1  ;;  %p225_p0 = scmp.eq.s32.totalorder %s1125_s18, 1 }
  0x28   : > { %s1788_s25 = scalar_select %p33_p8, %s1612_s29, %s35_s24  }
  0x29   : > { %p1792_p12 = por %p49_p1, %p48_p10  ;;  %p1796_p13 = por %p219_p11, %p42_p7 }
  0x2a   : > { %p44_p2 = por %p43_p9, %p42_p7  ;;  %s341_s9 = sand.u32 1, %s1612_s29  }
  0x2b   : > { %p1801_p4 = por %p225_p0, %p48_p10  ;;  %p1229_p6 = scmp.lt.s32.totalorder %s1616_s30, 2 }
  0x2c   : > { %s1135_s14 = sshll.u32 %s341_s9, 3  ;;  %s1136_s16 = sshll.u32 %s1616_s30, 3 }
  0x2d   : > { %s349_s15 = scalar_lea.hbm %s1971_s0, %s1136_s16  ;;  %s345_s21 = scalar_lea.vmem [#allocation2], %s1135_s14 }
  0x2e   : > { %s351_s20 = sshll.u32 %s349_s15, 4  ;;  %s353_s24 = sshll.u32 %s345_s21, 4  ;;  %s352_s20 = int_to_ptr.hbm [resolvable:$true] %s351_s20  ;;  %s354_s24 = int_to_ptr.vmem [resolvable:$true] %s353_s24 }
  0x2f   : > { %p1810_p8 = pnand %p1229_p6, %p44_p2  ;;  %s342_s22 = scalar_lea.sflag [#allocation3], %s341_s9 }
  0x30   : > { %s1504_s1 = sshra.s32 %s352_s20, 4  ;;  %s1511_s14 = scalar_lea.hbm %s1971_s0, 16  ;;  %s1505_s1 = int_to_ptr.hbm [resolvable:$true] %s1504_s1 }
  0x31   : > { %s1506_s2 = scalar_lea.hbm %s1505_s1, 8  ;;  %p1508_p9 = pneg %p1810_p8 }
  0x32   : > { %p1507_p7 = scmp.ne.s32.totalorder %s1505_s1, %s1506_s2  ;;  %p1512_p0 = scmp.lt.s32.totalorder %s1505_s1, %s1971_s0 }
  0x33   : > { %p1513_p2 = scmp.lt.s32.totalorder %s1511_s14, %s1506_s2 }
  0x34   : > { %p1509_p10 = pnand %p1508_p9, %p1507_p7 }
  0x35   : > { %p1514_p6 = por %p1513_p2, %p1512_p0 }
  0x36   : > { %p1510_p11 = pneg %p1509_p10 }
  0x38   : > { %p1515_p5 = pnand %p1514_p6, %p1510_p11 }
  0x3a   : > { %1518 = shalt.err (!%p1515_p5)
}
  0x3b   : > { %1217 = dma.hbm_to_vmem [thread:$0]  (!%p1810_p8), %s352_s20, 128, %s354_s24, %s342_s22  }
  0x3c   : > { %362 = sbr.rel (%p1711_p3) target bundleno = 839 (0x347), region = 52  ;;  %s1827_s9 = sand.u32 (!%p1711_p3), 1, %s1608_s28  }
  0x3d   : > { %s1138_s21 = sshll.u32 (!%p1711_p3), %s1827_s9, 3  ;;  %s365_s16 = scalar_lea.sflag (!%p1711_p3), [#allocation3], %s1827_s9 }
  0x3e   : > { %s368_s1 = scalar_lea.vmem (!%p1711_p3), [#allocation2], %s1138_s21 }
  0x41   : > { %1579 = dma.done.wait (%p1792_p12), %s365_s16, 128  }
  0x42   : > { %1581 = vsyncadd (%p1792_p12), %s365_s16, 4294967168 }
  0x43   : > { %1583 = dma.done.wait (%p49_p1), [#allocation6], 512  }
  0x44   : > { %1585 = vsyncadd (%p49_p1), [#allocation6], 4294966784 }
  0x45   : > { %1587 = dma.done.wait (%p49_p1), [#allocation9], 4096  }
  0x46   : > { %1589 = vsyncadd (%p49_p1), [#allocation9], 4294963200 }
  0x47   : > { %1591 = dma.done.wait (%p49_p1), [#allocation12], 4096  }
  0x48   : > { %1593 = vsyncadd (%p49_p1), [#allocation12], 4294963200 }
  0x49   : > { %1595 = dma.done.wait (%p49_p1), [#allocation15], 128  }
  0x4a   : > { %1597 = vsyncadd (%p49_p1), [#allocation15], 4294967168  ;;  %v1627_v0 = vmov 13   ;;  %v439_v1 = vld [vmem:[#allocation5 + $0x8] sm:$0xff]  ;;  %v438_v2 = vld [vmem:[#allocation5] sm:$0xff]  ;;  %vm440_vm0 = vcmask 130048  }
  0x4b   : > { %1289 = vset.pattern.permute.xlu0 %v1627_v0  ;;  %v1853_v3 = vld [vmem:[%s368_s1] sm:$0xff]  ;;  %458 = vmatpush.msra.mxu0 %v439_v1  ;;  %v1628_v18 = vmov 683565275   ;;  %v1629_v20 = vmov 2475754826   ;;  %s1157_s2 = sshll.u32 %s1706_s12, 3 }
  0x4c   : > { %v465_v4 = vld [vmem:[#allocation7 + $0x8] sm:$0xff]  ;;  %v464_v5 = vld [vmem:[#allocation7] sm:$0xff]  ;;  %804 = vperm.xlu0 %1289, %v1853_v3   ;;  %v1630_v23 = vmov 2131351028   ;;  %v1631_v26 = vmov 2102212464   ;;  %s983_s20 = scalar_lea.hbm %s1979_s8, %s1157_s2 }
  0x4d   : > { %480 = vmatpush.msra.mxu1 %v465_v4  ;;  %459 = vmatpush.msra.mxu0 %v438_v2  ;;  %v1632_v29 = vmov 920167782   ;;  %v1633_v32 = vmov 1326507024   ;;  %v1634_v2 = vmov 0   ;;  %s436_s24 = scalar_lea.vmem [#allocation16], %s1138_s21 }
  0x4e   : > { %1147 = vmatmul.msk.f32.vlgmr.msra.gmra.mxu0 %vm440_vm0, %v1853_v3  ;;  %s985_s18 = sshll.u32 %s436_s24, 4  ;;  %s987_s22 = sshll.u32 %s983_s20, 4  ;;  %s986_s18 = int_to_ptr.vmem [resolvable:$true] %s985_s18  ;;  %s988_s22 = int_to_ptr.hbm [resolvable:$true] %s987_s22 }
  0x4f   : > { %481 = vmatpush.msra.mxu1 %v464_v5  ;;  %s973_s17 = scalar_lea.sflag [#allocation4], %s1827_s9  ;;  %s1548_s14 = sshra.s32 %s988_s22, 4  ;;  %s1549_s14 = int_to_ptr.hbm [resolvable:$true] %s1548_s14 }
  0x50   : > { %1148 = vmatmul.msk.f32.vlgmr.msra.gmra.mxu1 %vm440_vm0, %v1853_v3  ;;  %s1550_s12 = scalar_lea.hbm %s1549_s14, 8  ;;  %s1554_s16 = scalar_lea.hbm %s1979_s8, 16 }
  0x51   : > { %p1551_p1 = scmp.ne.s32.totalorder %s1549_s14, %s1550_s12  ;;  %p1555_p12 = scmp.lt.s32.totalorder %s1549_s14, %s1979_s8 }
  0x52   : > { %p1556_p8 = scmp.lt.s32.totalorder %s1554_s16, %s1550_s12 }
  0x53   : > { %p1552_p3 = pnand %p1551_p1, %p1796_p13 }
  0x54   : > { %p1557_p7 = por %p1556_p8, %p1555_p12 }
  0x55   : > { %p1553_p5 = pneg %p1552_p3 }
  0x57   : > { %p1558_p9 = pnand %p1557_p7, %p1553_p5 }
  0xcb   : > { %v1858_v6 = vpop.f32.mrf.mxu0 }
  0xcc   : > { %v489_v7 = vand.u32 2139095040, %v1858_v6  ;;  %v486_v10 = vand.u32 2147483647, %v1858_v6  ;;  %vm488_vm13 = vcmp.lt.s32.totalorder %v1858_v6, 0  ;;  %vm629_vm15 = vweird.f32 %v1858_v6 }
  0xce   : > { %v490_v8 = vshrl.u32 %v489_v7, 23  ;;  %v493_v12 = vand.u32 8388607, %v486_v10  ;;  %vm1915_vm14 = vcmp.le.f32.partialorder %v486_v10, 0.7853982 }
  0xd0   : > { %v1149_v9 = vadd.s32 4294967169, %v490_v8  ;;  %v494_v16 = vor.u32 8388608, %v493_v12 }
  0xd2   : > { %v496_v11 = vadd.s32 1, %v1149_v9  ;;  %v1875_v39 = vshll.u32 %v494_v16, 8 }
  0xd4   : > { %vm497_vm1 = vcmp.gt.s32.totalorder %v496_v11, 0  ;;  %v535_v48 = vand.u32 65535, %v1875_v39  ;;  %v536_v49 = vshrl.u32 %v1875_v39, 16 }
  0xd5   : > { %v498_v13 = vsel %vm497_vm1, %v496_v11, 0 }
  0xd6   : > { %v500_v14 = vand.u32 31, %v498_v13  ;;  %v1866_v17 = vshrl.u32 %v498_v13, 5 }
  0xd8   : > { %v1864_v15 = vsub.s32 32, %v500_v14  ;;  %v503_v19 = vshll.u32 %v1628_v18, %v500_v14  ;;  %v506_v21 = vshll.u32 %v1629_v20, %v500_v14  ;;  %v509_v25 = vshll.u32 %v1630_v23, %v500_v14 }
  0xd9   : > { %v512_v28 = vshll.u32 %v1631_v26, %v500_v14  ;;  %v515_v31 = vshll.u32 %v1632_v29, %v500_v14  ;;  %vm518_vm2 = vcmp.lt.s32.totalorder %v1866_v17, 1  ;;  %vm521_vm3 = vcmp.lt.s32.totalorder %v1866_v17, 4 }
  0xda   : > { %v504_v22 = vshrl.u32 %v1629_v20, %v1864_v15  ;;  %v507_v24 = vshrl.u32 %v1630_v23, %v1864_v15  ;;  %v510_v27 = vshrl.u32 %v1631_v26, %v1864_v15  ;;  %v513_v30 = vshrl.u32 %v1632_v29, %v1864_v15 }
  0xdb   : > { %v516_v33 = vshrl.u32 %v1633_v32, %v1864_v15  ;;  %vm520_vm4 = vcmp.lt.s32.totalorder %v1866_v17, 3  ;;  %vm519_vm5 = vcmp.lt.s32.totalorder %v1866_v17, 2  ;;  %v502_v14 = vshrl.u32 %v1628_v18, %v1864_v15 }
  0xdc   : > { %v505_v34 = vor.u32 %v504_v22, %v503_v19  ;;  %v508_v35 = vor.u32 %v507_v24, %v506_v21  ;;  %v511_v36 = vor.u32 %v510_v27, %v509_v25  ;;  %v514_v37 = vor.u32 %v513_v30, %v512_v28 }
  0xdd   : > { %v517_v38 = vor.u32 %v516_v33, %v515_v31 }
  0xde   : > { %v526_v40 = vsel %vm518_vm2, %v505_v34, %v508_v35  ;;  %v530_v41 = vsel %vm518_vm2, %v508_v35, %v511_v36  ;;  %v527_v42 = vsel %vm521_vm3, %v514_v37, 920167782  ;;  %v523_v11 = vsel %vm521_vm3, %v511_v36, 2102212464 }
  0xdf   : > { %v531_v43 = vsel %vm521_vm3, %v517_v38, 1326507024  ;;  %v528_v44 = vsel %vm520_vm4, %v511_v36, %v527_v42  ;;  %v522_v23 = vsel %vm518_vm2, %v502_v14, %v505_v34  ;;  %v524_v24 = vsel %vm520_vm4, %v508_v35, %v523_v11  ;;  %v828_v36 = vld [vmem:[#allocation8 + $0x78] sm:$0xff]  ;;  %v826_v38 = vld [vmem:[#allocation8 + $0x68] sm:$0xff]  ;;  %v864_v11 = vld [vmem:[#allocation10 + $0x70] sm:$0xff] }
  0xe0   : > { %v532_v45 = vsel %vm520_vm4, %v514_v37, %v531_v43  ;;  %v529_v46 = vsel %vm519_vm5, %v526_v40, %v528_v44  ;;  %v525_v15 = vsel %vm519_vm5, %v522_v23, %v524_v24  ;;  %829 = vmatpush.msra.mxu2 %v828_v36  ;;  %v827_v37 = vld [vmem:[#allocation8 + $0x70] sm:$0xff]  ;;  %v824_v42 = vld [vmem:[#allocation8 + $0x58] sm:$0xff]  ;;  %v898_v14 = vld [vmem:[#allocation11 + $0x48] sm:$0xff] }
  0xe1   : > { %v533_v47 = vsel %vm519_vm5, %v530_v41, %v532_v45  ;;  %v559_v52 = vand.u32 65535, %v529_v46  ;;  %v560_v53 = vshrl.u32 %v529_v46, 16  ;;  %v579_v32 = vmul.u32 %v1875_v39, %v525_v15  ;;  %v825_v41 = vld [vmem:[#allocation8 + $0x60] sm:$0xff]  ;;  %v823_v44 = vld [vmem:[#allocation8 + $0x50] sm:$0xff]  ;;  %v822_v45 = vld [vmem:[#allocation8 + $0x48] sm:$0xff] }
  0xe2   : > { %v537_v50 = vand.u32 65535, %v533_v47  ;;  %v538_v51 = vshrl.u32 %v533_v47, 16  ;;  %830 = vmatpush.msra.mxu2 %v827_v37  ;;  %v861_v23 = vld [vmem:[#allocation10 + $0x58] sm:$0xff] }
  0xe3   : > { %v562_v56 = vmul.u32 %v560_v53, %v535_v48  ;;  %v563_v57 = vmul.u32 %v559_v52, %v536_v49  ;;  %v561_v61 = vmul.u32 %v559_v52, %v535_v48  ;;  %v564_v1 = vmul.u32 %v560_v53, %v536_v49  ;;  %v818_v52 = vld [vmem:[#allocation8 + $0x28] sm:$0xff] }
  0xe4   : > { %v540_v54 = vmul.u32 %v538_v51, %v535_v48  ;;  %v541_v55 = vmul.u32 %v537_v50, %v536_v49  ;;  %v539_v58 = vmul.u32 %v537_v50, %v535_v48  ;;  %v542_v60 = vmul.u32 %v538_v51, %v536_v49  ;;  %831 = vmatpush.msra.mxu2 %v826_v38  ;;  %v821_v48 = vld [vmem:[#allocation8 + $0x40] sm:$0xff]  ;;  %v820_v50 = vld [vmem:[#allocation8 + $0x38] sm:$0xff]  ;;  %v819_v51 = vld [vmem:[#allocation8 + $0x30] sm:$0xff] }
  0xe5   : > { %v565_v62 = vshll.u32 %v562_v56, 16  ;;  %v567_v5 = vshll.u32 %v563_v57, 16  ;;  %v566_v21 = vshrl.u32 %v562_v56, 16  ;;  %v568_v27 = vshrl.u32 %v563_v57, 16  ;;  %v817_v57 = vld [vmem:[#allocation8 + $0x20] sm:$0xff] }
  0xe6   : > { %v543_v59 = vshll.u32 %v540_v54, 16  ;;  %v545_v63 = vshll.u32 %v541_v55, 16  ;;  %v544_v16 = vshrl.u32 %v540_v54, 16  ;;  %v546_v25 = vshrl.u32 %v541_v55, 16  ;;  %832 = vmatpush.msra.mxu2 %v825_v41 }
  0xe7   : > { %vm569_vm7 = vc.u32 %v561_v61, %v565_v62  ;;  %v571_v7 = vadd.s32 %v565_v62, %v561_v61  ;;  %v816_v61 = vld [vmem:[#allocation8 + $0x18] sm:$0xff] }
  0xe8   : > { %vm547_vm6 = vc.u32 %v539_v58, %v543_v59  ;;  %v549_v0 = vadd.s32 %v543_v59, %v539_v58  ;;  %v570_v9 = vsel %vm569_vm7, 1, %v1634_v2  ;;  %833 = vmatpush.msra.mxu2 %v824_v42 }
  0xe9   : > { %v548_v4 = vsel %vm547_vm6, 1, %v1634_v2  ;;  %v572_v13 = vadd.s32 %v570_v9, %v564_v1  ;;  %vm573_vm9 = vc.u32 %v571_v7, %v567_v5  ;;  %v575_v30 = vadd.s32 %v571_v7, %v567_v5  ;;  %v815_v1 = vld [vmem:[#allocation8 + $0x10] sm:$0xff]  ;;  %v813_v7 = vld [vmem:[#allocation8] sm:$0xff]  ;;  %v865_v9 = vld [vmem:[#allocation10 + $0x78] sm:$0xff] }
  0xea   : > { %v550_v8 = vadd.s32 %v548_v4, %v542_v60  ;;  %vm551_vm8 = vc.u32 %v549_v0, %v545_v63  ;;  %v574_v20 = vsel %vm573_vm9, 1, %v1634_v2  ;;  %834 = vmatpush.msra.mxu2 %v823_v44  ;;  %868 = vmatpush.msra.mxu3 %v865_v9  ;;  %v903_v9 = vld [vmem:[#allocation11 + $0x70] sm:$0xff] }
  0xeb   : > { %v552_v12 = vsel %vm551_vm8, 1, %v1634_v2  ;;  %v576_v22 = vadd.s32 %v574_v20, %v572_v13  ;;  %v814_v2 = vld [vmem:[#allocation8 + $0x8] sm:$0xff] }
  0xec   : > { %v554_v19 = vadd.s32 %v552_v12, %v550_v8  ;;  %835 = vmatpush.msra.mxu2 %v822_v45  ;;  %v863_v13 = vld [vmem:[#allocation10 + $0x68] sm:$0xff]  ;;  %869 = vmatpush.msra.mxu3 %v864_v11 }
  0xed   : > { %v577_v28 = vadd.s32 %v576_v22, %v566_v21  ;;  %v862_v21 = vld [vmem:[#allocation10 + $0x60] sm:$0xff]  ;;  %v902_v11 = vld [vmem:[#allocation11 + $0x68] sm:$0xff] }
  0xee   : > { %v555_v26 = vadd.s32 %v554_v19, %v544_v16  ;;  %836 = vmatpush.msra.mxu2 %v821_v48  ;;  %870 = vmatpush.msra.mxu3 %v863_v13  ;;  %v900_v13 = vld [vmem:[#allocation11 + $0x58] sm:$0xff] }
  0xef   : > { %v578_v18 = vadd.s32 %v577_v28, %v568_v27  ;;  %v795_v28 = vlaneseq }
  0xf0   : > { %v556_v29 = vadd.s32 %v555_v26, %v546_v25  ;;  %837 = vmatpush.msra.mxu2 %v820_v50  ;;  %871 = vmatpush.msra.mxu3 %v862_v21  ;;  %v860_v26 = vld [vmem:[#allocation10 + $0x50] sm:$0xff]  ;;  %v894_v21 = vld [vmem:[#allocation11 + $0x28] sm:$0xff] }
  0xf1   : > { %v582_v31 = vadd.s32 1, %v578_v18  ;;  %v796_v36 = vand.u32 127, %v795_v28  ;;  %v943_v28 = vld [vmem:[#allocation13 + $0x78] sm:$0xff] }
  0xf2   : > { %vm581_vm10 = vc.u32 %v556_v29, %v575_v30  ;;  %838 = vmatpush.msra.mxu2 %v819_v51  ;;  %v580_v54 = vadd.s32 %v575_v30, %v556_v29  ;;  %872 = vmatpush.msra.mxu3 %v861_v23  ;;  %v859_v30 = vld [vmem:[#allocation10 + $0x48] sm:$0xff]  ;;  %v853_v51 = vld [vmem:[#allocation10 + $0x18] sm:$0xff] }
  0xf3   : > { %v583_v33 = vsel %vm581_vm10, %v582_v31, %v578_v18  ;;  %vm808_vm2 = vcmp.lt.s32.totalorder %v796_v36, 32  ;;  %vm798_vm8 = vcmp.lt.s32.totalorder %v796_v36, 74  ;;  %vm797_vm10 = vcmp.lt.s32.totalorder %v796_v36, 38  ;;  %v892_v23 = vld [vmem:[#allocation11 + $0x18] sm:$0xff]  ;;  %946 = vmatpush.msrb.mxu1 %v943_v28 }
  0xf4   : > { %v584_v34 = vadd.s32 %v583_v33, %v579_v32  ;;  %839 = vmatpush.msra.mxu2 %v818_v52  ;;  %873 = vmatpush.msra.mxu3 %v860_v26  ;;  %v858_v32 = vld [vmem:[#allocation10 + $0x40] sm:$0xff]  ;;  %v890_v26 = vld [vmem:[#allocation11 + $0x8] sm:$0xff] }
  0xf6   : > { %v585_v35 = vadd.s32 536870912, %v584_v34  ;;  %840 = vmatpush.msra.mxu2 %v817_v57  ;;  %874 = vmatpush.msra.mxu3 %v859_v30  ;;  %v941_v30 = vld [vmem:[#allocation13 + $0x68] sm:$0xff] }
  0xf8   : > { %v1909_v40 = vshrl.u32 %v585_v35, 30  ;;  %841 = vmatpush.msra.mxu2 %v816_v61  ;;  %v857_v35 = vld [vmem:[#allocation10 + $0x38] sm:$0xff]  ;;  %875 = vmatpush.msra.mxu3 %v858_v32  ;;  %v937_v32 = vld [vmem:[#allocation13 + $0x48] sm:$0xff] }
  0xfa   : > { %v587_v17 = vshll.u32 %v1909_v40, 30  ;;  %842 = vmatpush.msra.mxu2 %v815_v1  ;;  %v610_v19 = vsub.s32 4, %v1909_v40  ;;  %876 = vmatpush.msra.mxu3 %v857_v35  ;;  %v932_v35 = vld [vmem:[#allocation13 + $0x20] sm:$0xff] }
  0xfc   : > { %v588_v43 = vsub.s32 %v584_v34, %v587_v17  ;;  %843 = vmatpush.msra.mxu2 %v814_v2  ;;  %v611_v10 = vsel %vm488_vm13, %v610_v19, %v1909_v40  ;;  %v856_v17 = vld [vmem:[#allocation10 + $0x30] sm:$0xff]  ;;  %v896_v19 = vld [vmem:[#allocation11 + $0x38] sm:$0xff] }
  0xfd   : > { %v613_v18 = vsel %vm1915_vm14, 0, %v611_v10  ;;  %877 = vmatpush.msra.mxu3 %v856_v17  ;;  %v891_v10 = vld [vmem:[#allocation11 + $0x10] sm:$0xff] }
  0xfe   : > { %vm589_vm11 = vcmp.lt.s32.totalorder %v588_v43, 0  ;;  %v590_v39 = vsub.s32 0, %v588_v43  ;;  %844 = vmatpush.msra.mxu2 %v813_v7  ;;  %v630_v37 = vadd.s32 3, %v613_v18  ;;  %v785_v41 = vand.u32 3, %v613_v18  ;;  %v850_v7 = vld [vmem:[#allocation10] sm:$0xff]  ;;  %v939_v18 = vld [vmem:[#allocation13 + $0x58] sm:$0xff] }
 0x100   : > { %v591_v46 = vsel %vm589_vm11, %v590_v39, %v588_v43  ;;  %v805_v39 = vpop.permute.xlu0 %804  ;;  %v631_v45 = vand.u32 3, %v630_v37  ;;  %vm786_vm0 = vcmp.lt.s32.totalorder %v785_v41, 2  ;;  %vm787_vm1 = vcmp.eq.s32.totalorder %v785_v41, 0  ;;  %v933_v37 = vld [vmem:[#allocation13 + $0x28] sm:$0xff] }
 0x101   : > { %v592_v47 = vclz %v591_v46  ;;  %v855_v46 = vld [vmem:[#allocation10 + $0x28] sm:$0xff]  ;;  %vm790_vm4 = vcmp.eq.s32.totalorder %v785_v41, 2 }
 0x102   : > { %878 = vmatpush.msra.mxu3 %v855_v46  ;;  %vm632_vm5 = vcmp.lt.s32.totalorder %v631_v45, 2  ;;  %vm633_vm6 = vcmp.eq.s32.totalorder %v631_v45, 0  ;;  %vm636_vm7 = vcmp.eq.s32.totalorder %v631_v45, 2  ;;  %v1636_v45 = vmov 12   ;;  %v1292_v46 = vld [vmem:[#allocation14 + $0x1] ss:$0 sm:$0xff] }
 0x103   : > { %v1150_v49 = vadd.s32 4294967294, %v592_v47  ;;  %1290 = vset.pattern.permute.xlu0 %v1636_v45 }
 0x104   : > { %967 = vperm.xlu0 %1290, %v1853_v3  }
 0x105   : > { %vm1151_vm12 = vcmp.lt.s32.totalorder %v1150_v49, 0 }
 0x106   : > { %v595_v53 = vsel %vm1151_vm12, 0, %v1150_v49  ;;  %v854_v49 = vld [vmem:[#allocation10 + $0x20] sm:$0xff] }
 0x107   : > { %v596_v55 = vsub.s32 32, %v595_v53  ;;  %v600_v56 = vsub.s32 4294967266, %v595_v53  ;;  %v597_v58 = vshll.u32 %v588_v43, %v595_v53  ;;  %v802_v43 = vcvt.s32.f32 %v796_v36  ;;  %879 = vmatpush.msra.mxu3 %v854_v49  ;;  %v935_v36 = vld [vmem:[#allocation13 + $0x38] sm:$0xff] }
 0x109   : > { %v598_v59 = vshrl.u32 %v580_v54, %v596_v55  ;;  %v601_v60 = vadd.s32 127, %v600_v56  ;;  %vm807_vm3 = vcmp.eq.f32.partialorder %v805_v39, %v802_v43  ;;  %880 = vmatpush.msra.mxu3 %v853_v51  ;;  %v930_v43 = vld [vmem:[#allocation13 + $0x10] sm:$0xff]  ;;  %v928_v39 = vld [vmem:[#allocation13] sm:$0xff] }
 0x10a   : > { %vm809_vm9 = vmand %vm807_vm3, %vm808_vm2 }
 0x10b   : > { %v599_v62 = vor.u32 %v598_v59, %v597_v58  ;;  %v602_v63 = vshll.u32 %v601_v60, 23  ;;  %v852_v58 = vld [vmem:[#allocation10 + $0x10] sm:$0xff]  ;;  %v483_v59 = vpop.f32.mrf.mxu1 }
 0x10c   : > { %881 = vmatpush.msra.mxu3 %v852_v58 }
 0x10d   : > { %v603_v0 = vor.u32 4788187, %v602_v63  ;;  %v606_v5 = vcvt.s32.f32 %v599_v62 }
 0x10f   : > { %v604_v4 = vand.u32 2147483647, %v603_v0  ;;  %v1635_v0 = vmov 0.0  }
 0x110   : > { %v1155_v1 = vsel %vm809_vm9, 1.0, %v1635_v0 }
 0x111   : > { %v607_v8 = vmul.f32 %v606_v5, %v604_v4  ;;  %v851_v5 = vld [vmem:[#allocation10 + $0x8] sm:$0xff] }
 0x112   : > { %882 = vmatpush.msra.mxu3 %v851_v5 }
 0x113   : > { %v608_v12 = vxor.u32 2147483648, %v607_v8 }
 0x114   : > { %883 = vmatpush.msra.mxu3 %v850_v7 }
 0x115   : > { %v609_v16 = vsel %vm488_vm13, %v608_v12, %v607_v8  ;;  %v904_v8 = vld [vmem:[#allocation11 + $0x78] sm:$0xff]  ;;  %v901_v12 = vld [vmem:[#allocation11 + $0x60] sm:$0xff] }
 0x116   : > { %v612_v20 = vsel %vm1915_vm14, %v1858_v6, %v609_v16  ;;  %907 = vmatpush.msrb.mxu0 %v904_v8  ;;  %v897_v16 = vld [vmem:[#allocation11 + $0x40] sm:$0xff] }
 0x117   : > { %v614_v22 = vmul.f32 %v612_v20, %v612_v20 }
 0x118   : > { %908 = vmatpush.msrb.mxu0 %v903_v9 }
 0x119   : > { %v622_v24 = vmul.f32 -0.00019511016, %v614_v22  ;;  %v615_v25 = vmul.f32 -0.001358992, %v614_v22 }
 0x11a   : > { %909 = vmatpush.msrb.mxu0 %v902_v11 }
 0x11b   : > { %v623_v27 = vadd.f32 0.008332121, %v622_v24  ;;  %v616_v29 = vadd.f32 0.041655596, %v615_v25 }
 0x11c   : > { %910 = vmatpush.msrb.mxu0 %v901_v12 }
 0x11d   : > { %v624_v15 = vmul.f32 %v623_v27, %v614_v22  ;;  %v617_v31 = vmul.f32 %v616_v29, %v614_v22  ;;  %v889_v27 = vld [vmem:[#allocation11] sm:$0xff]  ;;  %v942_v29 = vld [vmem:[#allocation13 + $0x70] sm:$0xff] }
 0x11e   : > { %911 = vmatpush.msrb.mxu0 %v900_v13  ;;  %947 = vmatpush.msrb.mxu1 %v942_v29 }
 0x11f   : > { %v625_v33 = vadd.f32 -0.16666654, %v624_v15  ;;  %v618_v34 = vadd.f32 -0.4999988, %v617_v31  ;;  %v940_v15 = vld [vmem:[#allocation13 + $0x60] sm:$0xff]  ;;  %v938_v31 = vld [vmem:[#allocation13 + $0x50] sm:$0xff] }
 0x120   : > { %948 = vmatpush.msrb.mxu1 %v941_v30 }
 0x121   : > { %v626_v38 = vmul.f32 %v625_v33, %v614_v22  ;;  %v619_v40 = vmul.f32 %v618_v34, %v614_v22  ;;  %v893_v22 = vld [vmem:[#allocation11 + $0x20] sm:$0xff]  ;;  %v934_v34 = vld [vmem:[#allocation13 + $0x30] sm:$0xff] }
 0x122   : > { %949 = vmatpush.msrb.mxu1 %v940_v15  ;;  %v936_v33 = vld [vmem:[#allocation13 + $0x40] sm:$0xff] }
 0x123   : > { %v627_v42 = vadd.f32 1.0, %v626_v38  ;;  %v620_v44 = vadd.f32 1.0, %v619_v40  ;;  %v931_v38 = vld [vmem:[#allocation13 + $0x18] sm:$0xff]  ;;  %v1291_v40 = vld [vmem:[#allocation14] ss:$0 sm:$0xff] }
 0x124   : > { %950 = vmatpush.msrb.mxu1 %v939_v18 }
 0x125   : > { %v628_v47 = vmul.f32 %v627_v42, %v612_v20  ;;  %v637_v48 = vxor.u32 2147483648, %v620_v44  ;;  %v895_v20 = vld [vmem:[#allocation11 + $0x30] sm:$0xff] }
 0x126   : > { %951 = vmatpush.msrb.mxu1 %v938_v31 }
 0x127   : > { %v634_v50 = vxor.u32 2147483648, %v628_v47  ;;  %v638_v53 = vsel %vm636_vm7, %v637_v48, %v628_v47  ;;  %v792_v55 = vsel %vm790_vm4, %v637_v48, %v628_v47 }
 0x128   : > { %952 = vmatpush.msrb.mxu1 %v937_v32 }
 0x129   : > { %v635_v52 = vsel %vm633_vm6, %v620_v44, %v634_v50  ;;  %v789_v54 = vsel %vm787_vm1, %v620_v44, %v634_v50  ;;  %v929_v44 = vld [vmem:[#allocation13 + $0x8] sm:$0xff]  ;;  %v1293_v50 = vld [vmem:[#allocation14 + $0x2] ss:$0 sm:$0xff] }
 0x12a   : > { %v639_v56 = vsel %vm632_vm5, %v635_v52, %v638_v53  ;;  %v793_v57 = vsel %vm786_vm0, %v789_v54, %v792_v55  ;;  %953 = vmatpush.msrb.mxu1 %v936_v33 }
 0x12b   : > { %v640_v60 = vsel %vm629_vm15, nan, %v639_v56  ;;  %v794_v61 = vsel %vm629_vm15, nan, %v793_v57 }
 0x12c   : > { %v799_v62 = vsel %vm798_vm8, %v640_v60, %v794_v61  ;;  %954 = vmatpush.msrb.mxu1 %v935_v36 }
 0x12d   : > { %v800_v63 = vsel %vm797_vm10, %v1858_v6, %v799_v62  ;;  %v899_v6 = vld [vmem:[#allocation11 + $0x50] sm:$0xff] }
 0x12e   : > { %v801_v2 = vmul.f32 %v800_v63, %v483_v59  ;;  %912 = vmatpush.msrb.mxu0 %v899_v6  ;;  %955 = vmatpush.msrb.mxu1 %v934_v34 }
 0x130   : > { %v812_v4 = vadd.f32 %v1155_v1, %v801_v2  ;;  %913 = vmatpush.msrb.mxu0 %v898_v14  ;;  %956 = vmatpush.msrb.mxu1 %v933_v37 }
 0x132   : > { %845 = vmatmul.f32.vlgmr.msra.gmra.mxu2 %v812_v4  ;;  %914 = vmatpush.msrb.mxu0 %v897_v16 }
 0x133   : > { %957 = vmatpush.msrb.mxu1 %v932_v35 }
 0x134   : > { %915 = vmatpush.msrb.mxu0 %v896_v19 }
 0x135   : > { %958 = vmatpush.msrb.mxu1 %v931_v38 }
 0x136   : > { %916 = vmatpush.msrb.mxu0 %v895_v20 }
 0x137   : > { %959 = vmatpush.msrb.mxu1 %v930_v43 }
 0x138   : > { %917 = vmatpush.msrb.mxu0 %v894_v21 }
 0x139   : > { %960 = vmatpush.msrb.mxu1 %v929_v44 }
 0x13a   : > { %918 = vmatpush.msrb.mxu0 %v893_v22 }
 0x13b   : > { %961 = vmatpush.msrb.mxu1 %v928_v39 }
 0x13c   : > { %919 = vmatpush.msrb.mxu0 %v892_v23 }
 0x13e   : > { %920 = vmatpush.msrb.mxu0 %v891_v10 }
 0x140   : > { %921 = vmatpush.msrb.mxu0 %v890_v26 }
 0x142   : > { %922 = vmatpush.msrb.mxu0 %v889_v27 }
 0x176   : > { %v968_v52 = vpop.permute.xlu0 %967 }
 0x1b5   : > { %v846_v24 = vpop.f32.mrf.mxu2 }
 0x1b6   : > { %v849_v25 = vmax.f32 %v846_v24, 0.0 }
 0x1b8   : > { %884 = vmatmul.f32.vlgmr.msra.gmra.mxu3 %v849_v25 }
 0x23b   : > { %v885_v41 = vpop.f32.mrf.mxu3 }
 0x23c   : > { %v886_v17 = vadd.f32 %v1291_v40, %v885_v41 }
 0x23e   : > { %v888_v42 = vmax.f32 %v886_v17, 0.0 }
 0x240   : > { %923 = vmatmul.f32.vlgmr.msrb.gmra.mxu0 %v888_v42 }
 0x2bd   : > { %v924_v47 = vpop.f32.mrf.mxu0 }
 0x2be   : > { %v925_v48 = vadd.f32 %v1292_v46, %v924_v47 }
 0x2c0   : > { %v927_v49 = vmax.f32 %v925_v48, 0.0 }
 0x2c2   : > { %962 = vmatmul.f32.vlgmr.msrb.gmra.mxu1 %v927_v49 }
 0x33f   : > { %v963_v51 = vpop.f32.mrf.mxu1 }
 0x340   : > { %v964_v3 = vadd.f32 %v1293_v50, %v963_v51 }
 0x342   : > { %v970_v53 = vmul.f32 %v968_v52, %v964_v3 }
 0x344   : > { %971 = vst [vmem:[%s436_s24] sm:$0xff] %v970_v53 }
 0x345   : > { %1561 = shalt.err (!%p1558_p9)
}
 0x346   : > { %1190 = dma.vmem_to_hbm [thread:$0]  (%p1796_p13), %s986_s18, 128, %s988_s22, %s973_s17  }
 0x347 PF: > { %s999_s9 = sand.u32 1, %s1604_s27   ;;  %p1992_p10 = scmp.ge.s32.totalorder %s1616_s30, 2 }
 0x348   : > { %s1000_s2 = scalar_lea.sflag [#allocation4], %s999_s9 }
 0x349   : > { %p1219_p11 = pnand %p1992_p10, %p1801_p4 }
 0x34b   : > { %p1220_p0 = pneg %p1219_p11 }
 0x34d   : > { %1599 = dma.done.wait (%p1220_p0), %s1000_s2, 128  }
 0x34e   : > { %1601 = vsyncadd (%p1220_p0), %s1000_s2, 4294967168  ;;  %p25_p2 = scmp.ge.s32.totalorder %s1776_s23, 4   ;;  %s1993_s27 = smov %s1608_s28 }
 0x34f   : > { %s1994_s28 = smov %s1612_s29  ;;  %s1995_s29 = smov %s1788_s25 }
 0x350   : > { %s1996_s30 = smov %s1776_s23  ;;  %27 = sbr.rel (!%p25_p2) target bundleno = 12 (0xc), region = 125 }
 0x355   :  { %1006 = vsyncpa [#allocation3], 1 }
 0x356   :  { %1008 = vsyncpa [#allocation3 + $0x1], 1 }
 0x357   :  { %1009 = vsyncpa [#allocation6], 1 }
 0x358   :  { %1010 = vsyncpa [#allocation9], 1 }
 0x359   :  { %1011 = vsyncpa [#allocation12], 1 }
 0x35a   :  { %1012 = vsyncpa [#allocation15], 1 }
 0x35b   :  { %1013 = vsyncpa [#allocation4], 1 }
 0x35c   :  { %1015 = vsyncpa [#allocation4 + $0x1], 1 }

</bundles_post_ra>
